<compile_context>
chip_gen: v6e
topology: v6e:2x2x1
jax: 0.10.0
libtpu: 0.0.40
codegen_flags: <defaults>
</compile_context>

<pallas_src>
import functools

import jax
import jax.numpy as jnp
import numpy as np
from jax import lax
from jax.experimental import pallas as pl
from jax.experimental.pallas import tpu as pltpu

_LANES = 128
_SUBLANES = 8
_MAX_BLOCK_R = 256          # rows of 128 lanes per grid step (v5e-safe VMEM)
_SMALL_THETA2 = 1.0         # Taylor series for theta < 1 (f32-safe)


def _se3_exp_kernel(x_ref, o_ref):
    # x_ref: (6, R, 128) planes = [tau_x, tau_y, tau_z, phi_x, phi_y, phi_z]
    # o_ref: (7, R, 128) planes = [t_x, t_y, t_z, q_x, q_y, q_z, q_w]
    tx = x_ref[0]
    ty = x_ref[1]
    tz = x_ref[2]
    wx = x_ref[3]
    wy = x_ref[4]
    wz = x_ref[5]

    theta2 = wx * wx + wy * wy + wz * wz
    small = theta2 < _SMALL_THETA2

    # Single exact rsqrt replaces sqrt + select + divide.
    inv_t = lax.rsqrt(theta2 + 1e-30)       # ~1/theta (exact enough; 0-rows ok)
    theta = theta2 * inv_t                  # == theta (0 for padded zero rows)
    r2 = inv_t * inv_t                      # ~1/theta^2

    half = 0.5 * theta
    s = jnp.sin(half)
    c = jnp.cos(half)

    # imag = sin(theta/2)/theta  (series: 1/2 - t^2/48 + t^4/3840 - t^6/645120)
    imag = jnp.where(
        small,
        0.5 + theta2 * (-1.0 / 48.0 + theta2 * (1.0 / 3840.0
                                                - theta2 * (1.0 / 645120.0))),
        s * inv_t,
    )

    # Quaternion planes first: shorter live ranges, stores overlap later VALU work.
    o_ref[3] = wx * imag
    o_ref[4] = wy * imag
    o_ref[5] = wz * imag
    o_ref[6] = c

    # c1 = (1 - cos theta)/theta^2 = 2*(sin(theta/2)/theta)^2  (cancellation-free)
    c1 = 2.0 * imag * imag
    # c2 = (theta - sin theta)/theta^3,  sin theta = 2*s*c
    # series: 1/6 - t^2/120 + t^4/5040 - t^6/362880
    c2 = jnp.where(
        small,
        (1.0 / 6.0) + theta2 * (-1.0 / 120.0 + theta2 * (1.0 / 5040.0
                                                         - theta2 * (1.0 / 362880.0))),
        (theta - 2.0 * s * c) * r2 * inv_t,
    )

    # a = phi x tau ; b = phi x a ; t = tau + c1*a + c2*b  (left Jacobian applied)
    ax = wy * tz - wz * ty
    ay = wz * tx - wx * tz
    az = wx * ty - wy * tx
    bx = wy * az - wz * ay
    by = wz * ax - wx * az
    bz = wx * ay - wy * ax

    o_ref[0] = tx + c1 * ax + c2 * bx
    o_ref[1] = ty + c1 * ay + c2 * by
    o_ref[2] = tz + c1 * az + c2 * bz


@jax.jit
def se3_exp_pallas(xi):
    """xi: (M, 6) se(3) tangents [tau, phi] -> (M, 7) SE(3) [t, q_xyzw] (f32)."""
    xi = jnp.asarray(xi, jnp.float32)
    m = xi.shape[0]

    # Planar layout (6, r_pad, 128); r_pad a multiple of 8 and of the block size.
    r = -(-m // _LANES)
    r = max(r, _SUBLANES)
    r = -(-r // _SUBLANES) * _SUBLANES

    block_r = min(_MAX_BLOCK_R, r)
    # Once there are >= 2 blocks worth of rows, cap block at ~r/2 so the grid
    # has >= 2 parallel steps (gives v7x's second TensorCore work; neutral on
    # single-TC v5e/v6e).
    if r >= 2 * _SUBLANES:
        block_r = min(block_r, max(_SUBLANES, (r // 2) // _SUBLANES * _SUBLANES))
    r_pad = -(-r // block_r) * block_r
    m_pad = r_pad * _LANES

    # jnp.pad fuses with the transpose under jit (single relayout op).
    x = jnp.pad(xi.T, ((0, 0), (0, m_pad - m))).reshape(6, r_pad, _LANES)

    out = pl.pallas_call(
        _se3_exp_kernel,
        out_shape=jax.ShapeDtypeStruct((7, r_pad, _LANES), jnp.float32),
        grid=(r_pad // block_r,),
        in_specs=[pl.BlockSpec((6, block_r, _LANES), lambda i: (0, i, 0))],
        out_specs=pl.BlockSpec((7, block_r, _LANES), lambda i: (0, i, 0)),
        compiler_params=pltpu.CompilerParams(
            dimension_semantics=("parallel",)),
    )(x)

    return out.reshape(7, m_pad)[:, :m].T


@jax.jit
def _bad_nerf_forward(pose_adjustment, indices):
    """Exp() of the FULL parameter, then gather (matches `Exp()[indices]`)."""
    num_cameras, num_knots, dof = pose_adjustment.shape
    flat = pose_adjustment.reshape(num_cameras * num_knots, dof)
    exp_all = se3_exp_pallas(flat).reshape(num_cameras, num_knots, 7)
    return exp_all[indices.astype(jnp.int32)]


class BadNerfCameraOptimizerPallas:
    """JAX/Pallas port of BadNerfCameraOptimizer (mode='linear') forward."""

    def __init__(self, num_cameras, *, mode="linear", num_virtual_views=10,
                 initial_noise_se3_std=1e-5, key=None):
        assert mode == "linear", "only 'linear' mode implemented"
        self.num_cameras = num_cameras
        self.num_control_knots = 2
        self.dof = 6
        self.num_virtual_views = num_virtual_views
        if key is None:
            key = jax.random.PRNGKey(0)
        # pp.randn_se3(..., sigma=std): i.i.d. normal tangent-space noise.
        self.pose_adjustment = initial_noise_se3_std * jax.random.normal(
            key, (num_cameras, self.num_control_knots, self.dof), jnp.float32
        )
        # TODO(synk): non_trainable_camera_indices detach logic is an
        # autograd-time concern; forward values are identical, so it is omitted.

    def __call__(self, indices):
        """indices: (N,) int -> (N, num_control_knots, 7) SE(3) [t, q_xyzw]."""
        return _bad_nerf_forward(self.pose_adjustment, indices)


def _se3_exp_ref_np(xi):
    """float64 numpy reference (cancellation-aware) for validation."""
    xi = np.asarray(xi, np.float64)
    tau, phi = xi[..., :3], xi[..., 3:]
    theta2 = np.sum(phi * phi, axis=-1, keepdims=True)
    theta = np.sqrt(theta2)
    small = theta < 1e-3
    st = np.where(small, 1.0, theta)
    imag = np.where(small, 0.5 - theta2 / 48.0 + theta2 * theta2 / 3840.0,
                    np.sin(0.5 * theta) / st)
    q = np.concatenate([phi * imag, np.cos(0.5 * theta)], axis=-1)
    c1 = 2.0 * imag * imag
    c2 = np.where(small, 1.0 / 6.0 - theta2 / 120.0,
                  (theta - np.sin(theta)) / np.where(small, 1.0, theta2 * st))
    a = np.cross(phi, tau)
    b = np.cross(phi, a)
    t = tau + c1 * a + c2 * b
    return np.concatenate([t, q], axis=-1)


if __name__ == "__main__":
    key = jax.random.PRNGKey(0)
    k_param, k_idx, k_big = jax.random.split(key, 3)

    # --- Module forward (spec semantics): Exp() of full parameter, then gather.
    num_cameras = 16
    opt = BadNerfCameraOptimizerPallas(num_cameras, key=k_param)
    indices = jax.random.randint(k_idx, (8,), 0, num_cameras, dtype=jnp.int32)
    out = jax.block_until_ready(opt(indices))
    assert out.shape == (8, opt.num_control_knots, 7), out.shape

    ref = _se3_exp_ref_np(
        np.asarray(opt.pose_adjustment)[np.asarray(indices)].reshape(-1, 6)
    ).reshape(8, 2, 7)
    np.testing.assert_allclose(np.asarray(out), ref, atol=1e-6, rtol=1e-5)

    # --- Kernel numerics across magnitudes (zero, tiny, small/large branches).
    xi = jax.random.normal(k_big, (200, 6), jnp.float32)
    scales = jnp.concatenate([
        jnp.zeros((8,)), jnp.full((8,), 1e-6), jnp.full((8,), 1e-3),
        jnp.full((8,), 0.3), jnp.full((8,), 1.0), jnp.full((160,), 0.05),
    ])[:, None]
    xi = (xi * scales).astype(jnp.float32)
    got = jax.block_until_ready(se3_exp_pallas(xi))
    want = _se3_exp_ref_np(np.asarray(xi))
    np.testing.assert_allclose(np.asarray(got), want, atol=1e-5, rtol=1e-5)

    print("KERNEL_OK")
</pallas_src>

<mosaic_0001>
module attributes {stable_mosaic.version = 11 : i64} {
  func.func @_se3_exp_kernel(%arg0: i32, %arg1: memref<6x8x128xf32, #tpu.memory_space<vmem>>, %arg2: memref<7x8x128xf32, #tpu.memory_space<vmem>>) attributes {dimension_semantics = [#tpu.dimension_semantics<parallel>], iteration_bounds = array<i64: 1>, scalar_prefetch = 0 : i64, scratch_operands = 0 : i64, tpu.core_type = #tpu.core_type<tc>, window_params = [{transform_indices = @transform_0, window_bounds = array<i64: 6, 8, 128>}, {transform_indices = @transform_1, window_bounds = array<i64: 7, 8, 128>}]} {
    %c0 = arith.constant 0 : index
    %c0_0 = arith.constant 0 : index
    %c0_1 = arith.constant 0 : index
    %0 = vector.load %arg1[%c0, %c0_0, %c0_1] : memref<6x8x128xf32, #tpu.memory_space<vmem>>, vector<1x8x128xf32>
    %1 = vector.shape_cast %0 : vector<1x8x128xf32> to vector<8x128xf32>
    %c1 = arith.constant 1 : index
    %c0_2 = arith.constant 0 : index
    %c0_3 = arith.constant 0 : index
    %2 = vector.load %arg1[%c1, %c0_2, %c0_3] : memref<6x8x128xf32, #tpu.memory_space<vmem>>, vector<1x8x128xf32>
    %3 = vector.shape_cast %2 : vector<1x8x128xf32> to vector<8x128xf32>
    %c2 = arith.constant 2 : index
    %c0_4 = arith.constant 0 : index
    %c0_5 = arith.constant 0 : index
    %4 = vector.load %arg1[%c2, %c0_4, %c0_5] : memref<6x8x128xf32, #tpu.memory_space<vmem>>, vector<1x8x128xf32>
    %5 = vector.shape_cast %4 : vector<1x8x128xf32> to vector<8x128xf32>
    %c3 = arith.constant 3 : index
    %c0_6 = arith.constant 0 : index
    %c0_7 = arith.constant 0 : index
    %6 = vector.load %arg1[%c3, %c0_6, %c0_7] : memref<6x8x128xf32, #tpu.memory_space<vmem>>, vector<1x8x128xf32>
    %7 = vector.shape_cast %6 : vector<1x8x128xf32> to vector<8x128xf32>
    %c4 = arith.constant 4 : index
    %c0_8 = arith.constant 0 : index
    %c0_9 = arith.constant 0 : index
    %8 = vector.load %arg1[%c4, %c0_8, %c0_9] : memref<6x8x128xf32, #tpu.memory_space<vmem>>, vector<1x8x128xf32>
    %9 = vector.shape_cast %8 : vector<1x8x128xf32> to vector<8x128xf32>
    %c5 = arith.constant 5 : index
    %c0_10 = arith.constant 0 : index
    %c0_11 = arith.constant 0 : index
    %10 = vector.load %arg1[%c5, %c0_10, %c0_11] : memref<6x8x128xf32, #tpu.memory_space<vmem>>, vector<1x8x128xf32>
    %11 = vector.shape_cast %10 : vector<1x8x128xf32> to vector<8x128xf32>
    %12 = arith.mulf %7, %7 : vector<8x128xf32>
    %13 = arith.mulf %9, %9 : vector<8x128xf32>
    %14 = arith.addf %12, %13 : vector<8x128xf32>
    %15 = arith.mulf %11, %11 : vector<8x128xf32>
    %16 = arith.addf %14, %15 : vector<8x128xf32>
    %cst = arith.constant 1.000000e+00 : f32
    %17 = vector.broadcast %cst : f32 to vector<8x128xf32>
    %18 = arith.cmpf olt, %16, %17 : vector<8x128xf32>
    %cst_12 = arith.constant 1.000000e-30 : f32
    %19 = vector.broadcast %cst_12 : f32 to vector<8x128xf32>
    %20 = arith.addf %16, %19 : vector<8x128xf32>
    %21 = math.rsqrt %20 : vector<8x128xf32>
    %22 = arith.mulf %16, %21 : vector<8x128xf32>
    %23 = arith.mulf %21, %21 : vector<8x128xf32>
    %cst_13 = arith.constant 5.000000e-01 : f32
    %24 = vector.broadcast %cst_13 : f32 to vector<8x128xf32>
    %25 = arith.mulf %24, %22 : vector<8x128xf32>
    %26 = math.sin %25 : vector<8x128xf32>
    %27 = math.cos %25 : vector<8x128xf32>
    %cst_14 = arith.constant 1.55009923E-6 : f32
    %28 = vector.broadcast %cst_14 : f32 to vector<8x128xf32>
    %29 = arith.mulf %16, %28 : vector<8x128xf32>
    %cst_15 = arith.constant 2.6041668E-4 : f32
    %30 = vector.broadcast %cst_15 : f32 to vector<8x128xf32>
    %31 = arith.subf %30, %29 : vector<8x128xf32>
    %32 = arith.mulf %16, %31 : vector<8x128xf32>
    %cst_16 = arith.constant -0.020833334 : f32
    %33 = vector.broadcast %cst_16 : f32 to vector<8x128xf32>
    %34 = arith.addf %33, %32 : vector<8x128xf32>
    %35 = arith.mulf %16, %34 : vector<8x128xf32>
    %cst_17 = arith.constant 5.000000e-01 : f32
    %36 = vector.broadcast %cst_17 : f32 to vector<8x128xf32>
    %37 = arith.addf %36, %35 : vector<8x128xf32>
    %38 = arith.mulf %26, %21 : vector<8x128xf32>
    %39 = arith.select %18, %37, %38 : vector<8x128xi1>, vector<8x128xf32>
    %40 = arith.mulf %7, %39 : vector<8x128xf32>
    %c3_18 = arith.constant 3 : index
    %c0_19 = arith.constant 0 : index
    %c0_20 = arith.constant 0 : index
    %41 = vector.load %arg2[%c3_18, %c0_19, %c0_20] : memref<7x8x128xf32, #tpu.memory_space<vmem>>, vector<1x8x128xf32>
    %42 = vector.shape_cast %41 : vector<1x8x128xf32> to vector<8x128xf32>
    %43 = vector.shape_cast %40 : vector<8x128xf32> to vector<1x8x128xf32>
    tpu.vector_store %arg2[%c3_18, %c0_19, %c0_20], %43 {strides = array<i32>} : memref<7x8x128xf32, #tpu.memory_space<vmem>>, vector<1x8x128xf32>,
    %44 = arith.mulf %9, %39 : vector<8x128xf32>
    %c4_21 = arith.constant 4 : index
    %c0_22 = arith.constant 0 : index
    %c0_23 = arith.constant 0 : index
    %45 = vector.load %arg2[%c4_21, %c0_22, %c0_23] : memref<7x8x128xf32, #tpu.memory_space<vmem>>, vector<1x8x128xf32>
    %46 = vector.shape_cast %45 : vector<1x8x128xf32> to vector<8x128xf32>
    %47 = vector.shape_cast %44 : vector<8x128xf32> to vector<1x8x128xf32>
    tpu.vector_store %arg2[%c4_21, %c0_22, %c0_23], %47 {strides = array<i32>} : memref<7x8x128xf32, #tpu.memory_space<vmem>>, vector<1x8x128xf32>,
    %48 = arith.mulf %11, %39 : vector<8x128xf32>
    %c5_24 = arith.constant 5 : index
    %c0_25 = arith.constant 0 : index
    %c0_26 = arith.constant 0 : index
    %49 = vector.load %arg2[%c5_24, %c0_25, %c0_26] : memref<7x8x128xf32, #tpu.memory_space<vmem>>, vector<1x8x128xf32>
    %50 = vector.shape_cast %49 : vector<1x8x128xf32> to vector<8x128xf32>
    %51 = vector.shape_cast %48 : vector<8x128xf32> to vector<1x8x128xf32>
    tpu.vector_store %arg2[%c5_24, %c0_25, %c0_26], %51 {strides = array<i32>} : memref<7x8x128xf32, #tpu.memory_space<vmem>>, vector<1x8x128xf32>,
    %c6 = arith.constant 6 : index
    %c0_27 = arith.constant 0 : index
    %c0_28 = arith.constant 0 : index
    %52 = vector.load %arg2[%c6, %c0_27, %c0_28] : memref<7x8x128xf32, #tpu.memory_space<vmem>>, vector<1x8x128xf32>
    %53 = vector.shape_cast %52 : vector<1x8x128xf32> to vector<8x128xf32>
    %54 = vector.shape_cast %27 : vector<8x128xf32> to vector<1x8x128xf32>
    tpu.vector_store %arg2[%c6, %c0_27, %c0_28], %54 {strides = array<i32>} : memref<7x8x128xf32, #tpu.memory_space<vmem>>, vector<1x8x128xf32>,
    %cst_29 = arith.constant 2.000000e+00 : f32
    %55 = vector.broadcast %cst_29 : f32 to vector<8x128xf32>
    %56 = arith.mulf %55, %39 : vector<8x128xf32>
    %57 = arith.mulf %56, %39 : vector<8x128xf32>
    %cst_30 = arith.constant 2.75573188E-6 : f32
    %58 = vector.broadcast %cst_30 : f32 to vector<8x128xf32>
    %59 = arith.mulf %16, %58 : vector<8x128xf32>
    %cst_31 = arith.constant 1.98412701E-4 : f32
    %60 = vector.broadcast %cst_31 : f32 to vector<8x128xf32>
    %61 = arith.subf %60, %59 : vector<8x128xf32>
    %62 = arith.mulf %16, %61 : vector<8x128xf32>
    %cst_32 = arith.constant -0.00833333377 : f32
    %63 = vector.broadcast %cst_32 : f32 to vector<8x128xf32>
    %64 = arith.addf %63, %62 : vector<8x128xf32>
    %65 = arith.mulf %16, %64 : vector<8x128xf32>
    %cst_33 = arith.constant 0.166666672 : f32
    %66 = vector.broadcast %cst_33 : f32 to vector<8x128xf32>
    %67 = arith.addf %66, %65 : vector<8x128xf32>
    %cst_34 = arith.constant 2.000000e+00 : f32
    %68 = vector.broadcast %cst_34 : f32 to vector<8x128xf32>
    %69 = arith.mulf %68, %26 : vector<8x128xf32>
    %70 = arith.mulf %69, %27 : vector<8x128xf32>
    %71 = arith.subf %22, %70 : vector<8x128xf32>
    %72 = arith.mulf %71, %23 : vector<8x128xf32>
    %73 = arith.mulf %72, %21 : vector<8x128xf32>
    %74 = arith.select %18, %67, %73 : vector<8x128xi1>, vector<8x128xf32>
    %75 = arith.mulf %9, %5 : vector<8x128xf32>
    %76 = arith.mulf %11, %3 : vector<8x128xf32>
    %77 = arith.subf %75, %76 : vector<8x128xf32>
    %78 = arith.mulf %11, %1 : vector<8x128xf32>
    %79 = arith.mulf %7, %5 : vector<8x128xf32>
    %80 = arith.subf %78, %79 : vector<8x128xf32>
    %81 = arith.mulf %7, %3 : vector<8x128xf32>
    %82 = arith.mulf %9, %1 : vector<8x128xf32>
    %83 = arith.subf %81, %82 : vector<8x128xf32>
    %84 = arith.mulf %9, %83 : vector<8x128xf32>
    %85 = arith.mulf %11, %80 : vector<8x128xf32>
    %86 = arith.subf %84, %85 : vector<8x128xf32>
    %87 = arith.mulf %11, %77 : vector<8x128xf32>
    %88 = arith.mulf %7, %83 : vector<8x128xf32>
    %89 = arith.subf %87, %88 : vector<8x128xf32>
    %90 = arith.mulf %7, %80 : vector<8x128xf32>
    %91 = arith.mulf %9, %77 : vector<8x128xf32>
    %92 = arith.subf %90, %91 : vector<8x128xf32>
    %93 = arith.mulf %57, %77 : vector<8x128xf32>
    %94 = arith.addf %1, %93 : vector<8x128xf32>
    %95 = arith.mulf %74, %86 : vector<8x128xf32>
    %96 = arith.addf %94, %95 : vector<8x128xf32>
    %c0_35 = arith.constant 0 : index
    %c0_36 = arith.constant 0 : index
    %c0_37 = arith.constant 0 : index
    %97 = vector.load %arg2[%c0_35, %c0_36, %c0_37] : memref<7x8x128xf32, #tpu.memory_space<vmem>>, vector<1x8x128xf32>
    %98 = vector.shape_cast %97 : vector<1x8x128xf32> to vector<8x128xf32>
    %99 = vector.shape_cast %96 : vector<8x128xf32> to vector<1x8x128xf32>
    tpu.vector_store %arg2[%c0_35, %c0_36, %c0_37], %99 {strides = array<i32>} : memref<7x8x128xf32, #tpu.memory_space<vmem>>, vector<1x8x128xf32>,
    %100 = arith.mulf %57, %80 : vector<8x128xf32>
    %101 = arith.addf %3, %100 : vector<8x128xf32>
    %102 = arith.mulf %74, %89 : vector<8x128xf32>
    %103 = arith.addf %101, %102 : vector<8x128xf32>
    %c1_38 = arith.constant 1 : index
    %c0_39 = arith.constant 0 : index
    %c0_40 = arith.constant 0 : index
    %104 = vector.load %arg2[%c1_38, %c0_39, %c0_40] : memref<7x8x128xf32, #tpu.memory_space<vmem>>, vector<1x8x128xf32>
    %105 = vector.shape_cast %104 : vector<1x8x128xf32> to vector<8x128xf32>
    %106 = vector.shape_cast %103 : vector<8x128xf32> to vector<1x8x128xf32>
    tpu.vector_store %arg2[%c1_38, %c0_39, %c0_40], %106 {strides = array<i32>} : memref<7x8x128xf32, #tpu.memory_space<vmem>>, vector<1x8x128xf32>,
    %107 = arith.mulf %57, %83 : vector<8x128xf32>
    %108 = arith.addf %5, %107 : vector<8x128xf32>
    %109 = arith.mulf %74, %92 : vector<8x128xf32>
    %110 = arith.addf %108, %109 : vector<8x128xf32>
    %c2_41 = arith.constant 2 : index
    %c0_42 = arith.constant 0 : index
    %c0_43 = arith.constant 0 : index
    %111 = vector.load %arg2[%c2_41, %c0_42, %c0_43] : memref<7x8x128xf32, #tpu.memory_space<vmem>>, vector<1x8x128xf32>
    %112 = vector.shape_cast %111 : vector<1x8x128xf32> to vector<8x128xf32>
    %113 = vector.shape_cast %110 : vector<8x128xf32> to vector<1x8x128xf32>
    tpu.vector_store %arg2[%c2_41, %c0_42, %c0_43], %113 {strides = array<i32>} : memref<7x8x128xf32, #tpu.memory_space<vmem>>, vector<1x8x128xf32>,
    return
  }
  func.func @transform_0(%arg0: i32) -> (i32, i32, i32) {
    %c0_i32 = arith.constant 0 : i32
    %c0_i32_0 = arith.constant 0 : i32
    %c0_i32_1 = arith.constant 0 : i32
    return %c0_i32, %arg0, %c0_i32_0 : i32, i32, i32
  }
  func.func @transform_1(%arg0: i32) -> (i32, i32, i32) {
    %c0_i32 = arith.constant 0 : i32
    %c0_i32_0 = arith.constant 0 : i32
    %c0_i32_1 = arith.constant 0 : i32
    return %c0_i32, %arg0, %c0_i32_0 : i32, i32, i32
  }
}

</mosaic_0001>

<bundles_post_ra>
// kernel: se3_exp_pallas.1
= control target key start
LH: loop header
LB: loop body
LE: loop exit
PB: predicated region body
PF: predicated region fallthrough
CT: control target
= control target key end

     0   :  { %v344_v23 = vmov 683565275   ;;  %v345_v25 = vmov 2475754826   ;;  %v346_v27 = vmov 2131351028   ;;  %s488_s0 = inlined_call_operand.vmem [shape: f32[6,8,128], index: 0, kind: input, shape index: {}]   ;;  %s489_s1 = inlined_call_operand.vmem [shape: f32[7,8,128], index: 1, kind: output, shape index: {}]  }
   0x1   :  { %v363_v0 = vld [vmem:[%s488_s0 + $0x18] sm:$0xff]  ;;  %v368_v1 = vld [vmem:[%s488_s0 + $0x20] sm:$0xff]  ;;  %v373_v2 = vld [vmem:[%s488_s0 + $0x28] sm:$0xff]  ;;  %v347_v29 = vmov 2102212464  }
   0x2   :  { %v19_v3 = vmul.f32 %v363_v0, %v363_v0  ;;  %v20_v4 = vmul.f32 %v368_v1, %v368_v1  ;;  %v22_v5 = vmul.f32 %v373_v2, %v373_v2  ;;  %v348_v31 = vmov 920167782  }
   0x3   :  { %v349_v38 = vmov 1326507024  }
   0x4   :  { %v21_v6 = vadd.f32 %v20_v4, %v19_v3 }
   0x6   :  { %v381_v7 = vadd.f32 %v22_v5, %v21_v6 }
   0x8   :  { %v25_v8 = vadd.f32 1e-30, %v381_v7 }
   0xa   :  { %338 = vrsqrt.f32 %v25_v8 }
  0x17   :  { %v384_v9 = vpop.eup %338 }
  0x18   :  { %v388_v10 = vmul.f32 %v384_v9, %v381_v7 }
  0x1a   :  { %v391_v11 = vmul.f32 0.5, %v388_v10 }
  0x1c   :  { %v33_v12 = vand.u32 2139095040, %v391_v11  ;;  %v30_v14 = vand.u32 2147483647, %v391_v11  ;;  %vm32_vm7 = vcmp.lt.s32.totalorder %v391_v11, 0  ;;  %vm122_vm15 = vweird.f32 %v391_v11 }
  0x1e   :  { %v34_v13 = vshrl.u32 %v33_v12, 23  ;;  %v37_v17 = vand.u32 8388607, %v30_v14  ;;  %vm31_vm8 = vcmp.le.f32.partialorder %v30_v14, 0.7853982  ;;  %v417_v14 = vld [vmem:[%s488_s0 + $0x10] sm:$0xff] }
  0x20   :  { %v314_v15 = vadd.s32 4294967169, %v34_v13  ;;  %v38_v20 = vor.u32 8388608, %v37_v17 }
  0x22   :  { %v40_v16 = vadd.s32 1, %v314_v15  ;;  %v78_v40 = vshll.u32 %v38_v20, 8 }
  0x24   :  { %vm41_vm0 = vcmp.gt.s32.totalorder %v40_v16, 0 }
  0x25   :  { %v42_v18 = vsel %vm41_vm0, %v40_v16, 0  ;;  %vm24_vm0 = vcmp.lt.f32.partialorder %v381_v7, 1.0 }
  0x26   :  { %v44_v19 = vand.u32 31, %v42_v18  ;;  %v43_v21 = vshrl.u32 %v42_v18, 5 }
  0x28   :  { %v45_v22 = vsub.s32 32, %v44_v19  ;;  %v47_v24 = vshll.u32 %v344_v23, %v44_v19  ;;  %v50_v26 = vshll.u32 %v345_v25, %v44_v19  ;;  %v53_v28 = vshll.u32 %v346_v27, %v44_v19 }
  0x29   :  { %v56_v30 = vshll.u32 %v347_v29, %v44_v19  ;;  %v59_v32 = vshll.u32 %v348_v31, %v44_v19  ;;  %vm62_vm1 = vcmp.lt.s32.totalorder %v43_v21, 1  ;;  %vm65_vm2 = vcmp.lt.s32.totalorder %v43_v21, 4 }
  0x2a   :  { %v46_v33 = vshrl.u32 %v344_v23, %v45_v22  ;;  %v48_v34 = vshrl.u32 %v345_v25, %v45_v22  ;;  %v51_v35 = vshrl.u32 %v346_v27, %v45_v22  ;;  %v54_v36 = vshrl.u32 %v347_v29, %v45_v22 }
  0x2b   :  { %v57_v37 = vshrl.u32 %v348_v31, %v45_v22  ;;  %v60_v39 = vshrl.u32 %v349_v38, %v45_v22  ;;  %vm63_vm3 = vcmp.lt.s32.totalorder %v43_v21, 2  ;;  %vm64_vm4 = vcmp.lt.s32.totalorder %v43_v21, 3 }
  0x2c   :  { %v49_v41 = vor.u32 %v48_v34, %v47_v24  ;;  %v52_v42 = vor.u32 %v51_v35, %v50_v26  ;;  %v55_v43 = vor.u32 %v54_v36, %v53_v28  ;;  %v237_v34 = vmul.f32 1.5500992e-06, %v381_v7 }
  0x2d   :  { %v58_v44 = vor.u32 %v57_v37, %v56_v30  ;;  %v61_v45 = vor.u32 %v60_v39, %v59_v32 }
  0x2e   :  { %v66_v46 = vsel %vm62_vm1, %v46_v33, %v49_v41  ;;  %v67_v47 = vsel %vm65_vm2, %v55_v43, 2102212464  ;;  %v70_v48 = vsel %vm62_vm1, %v49_v41, %v52_v42  ;;  %v74_v49 = vsel %vm62_vm1, %v52_v42, %v55_v43 }
  0x2f   :  { %v68_v50 = vsel %vm64_vm4, %v52_v42, %v67_v47  ;;  %v71_v51 = vsel %vm65_vm2, %v58_v44, 920167782  ;;  %v75_v52 = vsel %vm65_vm2, %v61_v45, 1326507024  ;;  %v238_v38 = vsub.f32 0.00026041668, %v237_v34 }
  0x30   :  { %v72_v53 = vsel %vm64_vm4, %v55_v43, %v71_v51  ;;  %v76_v54 = vsel %vm64_vm4, %v58_v44, %v75_v52  ;;  %v69_v55 = vsel %vm63_vm3, %v66_v46, %v68_v50  ;;  %v422_v44 = vld [vmem:[%s488_s0] sm:$0xff]  ;;  %v427_v45 = vld [vmem:[%s488_s0 + $0x8] sm:$0xff]  ;;  %v274_v51 = vmul.f32 %v363_v0, %v417_v14 }
  0x31   :  { %v73_v56 = vsel %vm63_vm3, %v70_v48, %v72_v53  ;;  %v77_v57 = vsel %vm63_vm3, %v74_v49, %v76_v54  ;;  %v85_v62 = vmul.u32 %v78_v40, %v69_v55  ;;  %v239_v41 = vmul.f32 %v238_v38, %v381_v7 }
  0x32   :  { %v397_v58 = vmul.u32.u64.low %v78_v40, %v77_v57  ;;  %v398_v59 = vmul.u32.u64.high %v78_v40, %v77_v57, %v397_v58  ;;  %v400_v60 = vmul.u32.u64.low %v78_v40, %v73_v56  ;;  %v401_v61 = vmul.u32.u64.high %v78_v40, %v73_v56, %v400_v60 }
  0x33   :  { %v258_v40 = vmul.f32 2.7557319e-06, %v381_v7  ;;  %v240_v47 = vadd.f32 -0.020833334, %v239_v41  ;;  %v270_v48 = vmul.f32 %v368_v1, %v417_v14  ;;  %v271_v49 = vmul.f32 %v373_v2, %v427_v45 }
  0x34   :  { %vm87_vm5 = vc.u32 %v398_v59, %v400_v60  ;;  %v88_v63 = vadd.s32 1, %v401_v61  ;;  %v86_v18 = vadd.s32 %v400_v60, %v398_v59  ;;  %v273_v50 = vmul.f32 %v373_v2, %v422_v44 }
  0x35   :  { %v259_v46 = vsub.f32 0.0001984127, %v258_v40  ;;  %v276_v52 = vmul.f32 %v363_v0, %v427_v45  ;;  %v277_v55 = vmul.f32 %v368_v1, %v422_v44  ;;  %v241_v58 = vmul.f32 %v240_v47, %v381_v7 }
  0x36   :  { %v89_v3 = vsel %vm87_vm5, %v88_v63, %v401_v61 }
  0x37   :  { %v90_v4 = vadd.s32 %v89_v3, %v85_v62  ;;  %v260_v54 = vmul.f32 %v259_v46, %v381_v7  ;;  %v272_v62 = vsub.f32 %v270_v48, %v271_v49 }
  0x39   :  { %v91_v5 = vadd.s32 536870912, %v90_v4 }
  0x3b   :  { %v92_v6 = vshrl.u32 %v91_v5, 30  ;;  %v278_v5 = vsub.f32 %v276_v52, %v277_v55 }
  0x3d   :  { %v93_v8 = vshll.u32 %v92_v6, 30  ;;  %v116_v31 = vsub.s32 4, %v92_v6 }
  0x3f   :  { %v94_v12 = vsub.s32 %v90_v4, %v93_v8  ;;  %v117_v35 = vsel %vm32_vm7, %v116_v31, %v92_v6  ;;  %v275_v4 = vsub.f32 %v273_v50, %v274_v51  ;;  %v242_v8 = vadd.f32 0.5, %v241_v58 }
  0x40   :  { %v119_v37 = vsel %vm31_vm8, 0, %v117_v35 }
  0x41   :  { %v96_v13 = vsub.s32 0, %v94_v12  ;;  %v123_v39 = vadd.s32 3, %v119_v37  ;;  %v227_v43 = vand.u32 3, %v119_v37 }
  0x43   :  { %v315_v15 = vmin.u32 %v96_v13, %v94_v12  ;;  %v124_v42 = vand.u32 3, %v123_v39  ;;  %vm232_vm10 = vcmp.eq.s32.totalorder %v227_v43, 2  ;;  %vm229_vm12 = vcmp.eq.s32.totalorder %v227_v43, 0 }
  0x44   :  { %vm228_vm14 = vcmp.lt.s32.totalorder %v227_v43, 2  ;;  %v261_v13 = vadd.f32 -0.008333334, %v260_v54 }
  0x45   :  { %v98_v16 = vclz %v315_v15  ;;  %vm129_vm9 = vcmp.eq.s32.totalorder %v124_v42, 2  ;;  %vm126_vm11 = vcmp.eq.s32.totalorder %v124_v42, 0  ;;  %vm125_vm13 = vcmp.lt.s32.totalorder %v124_v42, 2 }
  0x47   :  { %v316_v17 = vadd.s32 4294967294, %v98_v16 }
  0x49   :  { %vm317_vm6 = vcmp.lt.s32.totalorder %v316_v17, 0 }
  0x4a   :  { %v101_v19 = vsel %vm317_vm6, 0, %v316_v17 }
  0x4b   :  { %v102_v20 = vsub.s32 32, %v101_v19  ;;  %v103_v21 = vshll.u32 %v94_v12, %v101_v19  ;;  %v106_v22 = vsub.s32 4294967266, %v101_v19  ;;  %v286_v19 = vmul.f32 %v368_v1, %v272_v62 }
  0x4d   :  { %v104_v23 = vshrl.u32 %v86_v18, %v102_v20  ;;  %v107_v24 = vadd.s32 127, %v106_v22  ;;  %v282_v18 = vmul.f32 %v373_v2, %v272_v62  ;;  %v279_v20 = vmul.f32 %v368_v1, %v278_v5 }
  0x4e   :  { %v283_v22 = vmul.f32 %v363_v0, %v278_v5 }
  0x4f   :  { %v105_v25 = vor.u32 %v104_v23, %v103_v21  ;;  %v108_v26 = vshll.u32 %v107_v24, 23  ;;  %v280_v21 = vmul.f32 %v373_v2, %v275_v4  ;;  %v285_v23 = vmul.f32 %v363_v0, %v275_v4 }
  0x51   :  { %v109_v27 = vor.u32 4788187, %v108_v26  ;;  %v112_v28 = vcvt.s32.f32 %v105_v25  ;;  %v28_v25 = vmul.f32 %v384_v9, %v384_v9  ;;  %v281_v34 = vsub.f32 %v279_v20, %v280_v21 }
  0x53   :  { %v110_v29 = vand.u32 2147483647, %v109_v27  ;;  %v262_v27 = vmul.f32 %v261_v13, %v381_v7 }
  0x55   :  { %v113_v30 = vmul.f32 %v112_v28, %v110_v29 }
  0x57   :  { %v114_v32 = vxor.u32 2147483648, %v113_v30 }
  0x59   :  { %v115_v33 = vsel %vm32_vm7, %v114_v32, %v113_v30 }
  0x5a   :  { %v118_v36 = vsel %vm31_vm8, %v391_v11, %v115_v33 }
  0x5b   :  { %340 = vcosq.f32 %v118_v36 }
  0x5c   :  { %342 = vsinq.f32 %v118_v36 }
  0x68   :  { %v341_v53 = vpop.eup %340 }
  0x69   :  { %v343_v56 = vpop.eup %342  ;;  %v130_v57 = vxor.u32 2147483648, %v341_v53 }
  0x6a   :  { %v127_v59 = vxor.u32 2147483648, %v343_v56 }
  0x6b   :  { %v131_v60 = vsel %vm129_vm9, %v130_v57, %v343_v56  ;;  %v234_v61 = vsel %vm232_vm10, %v130_v57, %v343_v56 }
  0x6c   :  { %v128_v63 = vsel %vm126_vm11, %v341_v53, %v127_v59  ;;  %v231_v3 = vsel %vm229_vm12, %v341_v53, %v127_v59 }
  0x6d   :  { %v132_v6 = vsel %vm125_vm13, %v128_v63, %v131_v60  ;;  %v235_v12 = vsel %vm228_vm14, %v231_v3, %v234_v61 }
  0x6e   :  { %v133_v15 = vsel %vm122_vm15, nan, %v132_v6  ;;  %v236_v16 = vsel %vm122_vm15, nan, %v235_v12 }
  0x6f   :  { %v243_v17 = vmul.f32 %v384_v9, %v133_v15  ;;  %325 = vst [vmem:[%s489_s1 + $0x30] sm:$0xff] %v236_v16  ;;  %v264_v11 = vmul.f32 2.0, %v133_v15 }
  0x71   :  { %v244_v24 = vsel %vm24_vm0, %v242_v8, %v243_v17  ;;  %v265_v26 = vmul.f32 %v264_v11, %v236_v16 }
  0x72   :  { %v245_v28 = vmul.f32 %v363_v0, %v244_v24  ;;  %v248_v29 = vmul.f32 %v368_v1, %v244_v24  ;;  %v251_v30 = vmul.f32 %v373_v2, %v244_v24  ;;  %v256_v31 = vmul.f32 2.0, %v244_v24 }
  0x73   :  { %v266_v32 = vsub.f32 %v388_v10, %v265_v26  ;;  %v263_v1 = vadd.f32 0.16666667, %v262_v27  ;;  %v284_v2 = vsub.f32 %v282_v18, %v283_v22  ;;  %v287_v10 = vsub.f32 %v285_v23, %v286_v19 }
  0x74   :  { %322 = vst [vmem:[%s489_s1 + $0x18] sm:$0xff] %v245_v28  ;;  %323 = vst [vmem:[%s489_s1 + $0x20] sm:$0xff] %v248_v29  ;;  %v257_v0 = vmul.f32 %v256_v31, %v244_v24 }
  0x75   :  { %324 = vst [vmem:[%s489_s1 + $0x28] sm:$0xff] %v251_v30  ;;  %v267_v33 = vmul.f32 %v266_v32, %v28_v25 }
  0x76   :  { %v288_v35 = vmul.f32 %v272_v62, %v257_v0  ;;  %v293_v36 = vmul.f32 %v275_v4, %v257_v0  ;;  %v299_v37 = vmul.f32 %v278_v5, %v257_v0 }
  0x77   :  { %v268_v38 = vmul.f32 %v384_v9, %v267_v33 }
  0x78   :  { %v289_v39 = vadd.f32 %v288_v35, %v422_v44  ;;  %v294_v40 = vadd.f32 %v427_v45, %v293_v36  ;;  %v300_v41 = vadd.f32 %v417_v14, %v299_v37 }
  0x79   :  { %v269_v42 = vsel %vm24_vm0, %v263_v1, %v268_v38 }
  0x7a   :  { %v290_v43 = vmul.f32 %v281_v34, %v269_v42  ;;  %v295_v46 = vmul.f32 %v284_v2, %v269_v42  ;;  %v301_v47 = vmul.f32 %v287_v10, %v269_v42 }
  0x7c   :  { %v291_v48 = vadd.f32 %v290_v43, %v289_v39  ;;  %v296_v49 = vadd.f32 %v295_v46, %v294_v40  ;;  %v302_v50 = vadd.f32 %v301_v47, %v300_v41 }
  0x7e   :  { %292 = vst [vmem:[%s489_s1] sm:$0xff] %v291_v48  ;;  %326 = vst [vmem:[%s489_s1 + $0x8] sm:$0xff] %v296_v49 }
  0x7f   :  { %327 = vst [vmem:[%s489_s1 + $0x10] sm:$0xff] %v302_v50 }

</bundles_post_ra>
